<compile_context>
chip_gen: v5e
topology: v5e:2x2
jax: 0.10.0
libtpu: 0.0.40
codegen_flags: <defaults>
</compile_context>

<pallas_src>
import math

import jax
import jax.numpy as jnp
from jax.experimental import pallas as pl
from jax.experimental.pallas import tpu as pltpu


def _round_up(x, m):
    return ((int(x) + m - 1) // m) * m


# --------------------------------------------------------------------------- #
# Kernel
# --------------------------------------------------------------------------- #
def make_dueling_kernel(k1p, n_actions):
    """Kernel closure with static slab row offsets (all multiples of 16 for bf16)."""
    o2 = k1p          # fc2 weights
    o3 = k1p + 32     # fused [fc_value | fc_advantage] weights
    o4 = k1p + 64     # folded dueling head weights

    def kernel(x_ref, w_ref, b_ref, q_ref):
        cdt = w_ref.dtype  # bf16 compute dtype for MXU inputs

        # fc1 + relu   (dropout1 is identity at inference)
        h = jnp.dot(x_ref[...], w_ref[0:k1p, 0:32],
                    preferred_element_type=jnp.float32) + b_ref[0:1, 0:32]
        h = jnp.maximum(h, 0.0)

        # fc2 + relu   (dropout2 is identity at inference)
        h = jnp.dot(h.astype(cdt), w_ref[o2:o2 + 32, 0:32],
                    preferred_element_type=jnp.float32) + b_ref[1:2, 0:32]
        h = jnp.maximum(h, 0.0)

        # fused branch hidden layer: [fc_value | fc_advantage] -> (TB, 64)
        br = jnp.dot(h.astype(cdt), w_ref[o3:o3 + 32, 0:64],
                     preferred_element_type=jnp.float32) + b_ref[2:3, 0:64]
        br = jnp.maximum(br, 0.0)

        # folded dueling head: Q = br @ W_head_q + b_head_q
        # (value broadcast and advantage-mean subtraction already folded into the weights)
        q_ref[...] = (jnp.dot(br.astype(cdt), w_ref[o4:o4 + 64, 0:n_actions],
                              preferred_element_type=jnp.float32)
                      + b_ref[3:4, 0:n_actions])

    return kernel


# --------------------------------------------------------------------------- #
# Wrapper
# --------------------------------------------------------------------------- #
def dueling_q_forward(state, static_state, fparams, *, batch_tile=512, min_grid_steps=2):
    """Forward pass. `fparams` comes from `prepare_fused_params` (done once)."""
    B = state.shape[0]
    k_in = fparams["k_in"]
    k1p = fparams["k1p"]
    n_actions = fparams["n_actions"]
    w_slab = fparams["w_slab"]
    b_slab = fparams["b_slab"]
    cdt = w_slab.dtype

    # One host-side concat + feature pad (zero columns hit zero W1 rows -> exact).
    x = jnp.concatenate([state, static_state], axis=-1).astype(cdt)
    if k1p != k_in:
        x = jnp.pad(x, ((0, 0), (0, k1p - k_in)))

    # Batch tiling: multiple of 16 (bf16 sublane packing), as large as the batch allows
    # (amortizes ~0.35us per-grid-step overhead), but keep >= min_grid_steps steps when
    # possible so both v7x TensorCores get work (irrelevant on single-TC v5e/v6e).
    b16 = max(16, _round_up(B, 16))
    bt = max(16, (int(batch_tile) // 16) * 16)      # sanitize caller tile to multiple of 16
    tb = min(bt, b16)
    if min_grid_steps > 1:
        tb = min(tb, _round_up(-(-b16 // min_grid_steps), 16))
    tb = max(16, tb)
    b_pad = _round_up(B, tb)
    if b_pad != B:
        x = jnp.pad(x, ((0, b_pad - B), (0, 0)))

    grid = (b_pad // tb,)

    flops = 2 * b_pad * (k1p * 32 + 32 * 32 + 32 * 64 + 64 * n_actions)
    bytes_accessed = (x.size * 2 + w_slab.size * 2 + b_slab.size * 4
                      + b_pad * n_actions * 4)

    q = pl.pallas_call(
        make_dueling_kernel(k1p, n_actions),
        out_shape=jax.ShapeDtypeStruct((b_pad, n_actions), jnp.float32),
        grid=grid,
        in_specs=[
            pl.BlockSpec((tb, k1p), lambda i: (i, 0)),
            # constant slabs: same block every step -> DMA'd once, no re-fetch
            pl.BlockSpec(w_slab.shape, lambda i: (0, 0)),
            pl.BlockSpec(b_slab.shape, lambda i: (0, 0)),
        ],
        out_specs=pl.BlockSpec((tb, n_actions), lambda i: (i, 0)),
        compiler_params=pltpu.CompilerParams(
            dimension_semantics=("parallel",)),
        cost_estimate=pl.CostEstimate(
            flops=flops, transcendentals=0, bytes_accessed=bytes_accessed),
    )(x, w_slab, b_slab)

    return q[:B]


# --------------------------------------------------------------------------- #
# Parameters
# --------------------------------------------------------------------------- #
def init_params(key, input_dims, static_state_dims, n_actions):
    """Deterministic init mimicking torch.nn.Linear default (uniform +/- 1/sqrt(fan_in)).
    Weights stored as (in, out) so y = x @ W + b (== torch x @ W.T + b)."""
    dims = [
        ("w1", "b1", input_dims + static_state_dims, 32),
        ("w2", "b2", 32, 32),
        ("wv1", "bv1", 32, 32),
        ("wv2", "bv2", 32, 1),
        ("wa1", "ba1", 32, 32),
        ("wa2", "ba2", 32, n_actions),
    ]
    params = {}
    for wname, bname, fan_in, fan_out in dims:
        key, kw, kb = jax.random.split(key, 3)
        bound = 1.0 / math.sqrt(fan_in)
        params[wname] = jax.random.uniform(
            kw, (fan_in, fan_out), minval=-bound, maxval=bound, dtype=jnp.float32)
        params[bname] = jax.random.uniform(
            kb, (1, fan_out), minval=-bound, maxval=bound, dtype=jnp.float32)
    return params


def prepare_fused_params(params, input_dims, static_state_dims,
                         compute_dtype=jnp.bfloat16):
    """One-time host-side fusion: dueling fold + branch fusion + slab packing + bf16 cast."""
    n_actions = params["wa2"].shape[1]
    k_in = input_dims + static_state_dims
    k1p = _round_up(k_in, 16)            # pad fc1 K to a multiple of 16 (bf16 sublanes)

    # ---- fold dueling combine into the head (exact, done in f32 before bf16 cast) ----
    wv2 = params["wv2"]                                           # (32, 1)
    wa2 = params["wa2"]                                           # (32, A)
    wa2_centered = wa2 - wa2.mean(axis=1, keepdims=True)          # (32, A)
    w_head_q = jnp.concatenate(
        [jnp.broadcast_to(wv2, (32, n_actions)), wa2_centered], axis=0)   # (64, A)
    b_head_q = params["bv2"] + params["ba2"] - params["ba2"].mean(axis=1, keepdims=True)

    # ---- fused [fc_value | fc_advantage] hidden layer ----
    w_branch = jnp.concatenate([params["wv1"], params["wa1"]], axis=1)    # (32, 64)
    b_branch = jnp.concatenate([params["bv1"], params["ba1"]], axis=1)    # (1, 64)

    # ---- pack all weights into one bf16 slab, sub-matrices at 16-row offsets ----
    slab_cols = max(64, n_actions)
    w1p = jnp.zeros((k1p, slab_cols), jnp.float32).at[:k_in, :32].set(params["w1"])
    w2p = jnp.zeros((32, slab_cols), jnp.float32).at[:, :32].set(params["w2"])
    wbp = jnp.zeros((32, slab_cols), jnp.float32).at[:, :64].set(w_branch)
    whp = jnp.zeros((64, slab_cols), jnp.float32).at[:, :n_actions].set(w_head_q)
    w_slab = jnp.concatenate([w1p, w2p, wbp, whp], axis=0).astype(compute_dtype)

    # ---- pack all biases into one f32 slab padded to (8, >=128) ----
    bias_cols = max(128, slab_cols)
    b_slab = jnp.zeros((8, bias_cols), jnp.float32)
    b_slab = b_slab.at[0, :32].set(params["b1"][0])
    b_slab = b_slab.at[1, :32].set(params["b2"][0])
    b_slab = b_slab.at[2, :64].set(b_branch[0])
    b_slab = b_slab.at[3, :n_actions].set(b_head_q[0])

    return {"w_slab": w_slab, "b_slab": b_slab,
            "k_in": k_in, "k1p": k1p, "n_actions": n_actions}


# --------------------------------------------------------------------------- #
# References
# --------------------------------------------------------------------------- #
def reference_forward_f32(state, static_state, params):
    """Pure-JAX full-f32 reference matching the original torch module math."""
    x = jnp.concatenate([state, static_state], axis=-1)
    h = jax.nn.relu(x @ params["w1"] + params["b1"])
    h = jax.nn.relu(h @ params["w2"] + params["b2"])
    v = jax.nn.relu(h @ params["wv1"] + params["bv1"])
    val = v @ params["wv2"] + params["bv2"]
    a = jax.nn.relu(h @ params["wa1"] + params["ba1"])
    adv = a @ params["wa2"] + params["ba2"]
    return val + (adv - adv.mean(axis=1, keepdims=True))


def reference_forward_fused(state, static_state, fparams):
    """Pure-JAX mirror of the kernel math (bf16 MXU inputs, f32 accumulation, folded head)."""
    w, b = fparams["w_slab"], fparams["b_slab"]
    k_in, k1p, A = fparams["k_in"], fparams["k1p"], fparams["n_actions"]
    cdt = w.dtype
    mm = lambda a_, b_: jnp.dot(a_.astype(cdt), b_, preferred_element_type=jnp.float32)

    x = jnp.concatenate([state, static_state], axis=-1).astype(cdt)
    if k1p != k_in:
        x = jnp.pad(x, ((0, 0), (0, k1p - k_in)))
    h = jnp.maximum(mm(x, w[0:k1p, 0:32]) + b[0:1, 0:32], 0.0)
    h = jnp.maximum(mm(h, w[k1p:k1p + 32, 0:32]) + b[1:2, 0:32], 0.0)
    br = jnp.maximum(mm(h, w[k1p + 32:k1p + 64, 0:64]) + b[2:3, 0:64], 0.0)
    return mm(br, w[k1p + 64:k1p + 128, 0:A]) + b[3:4, 0:A]


# --------------------------------------------------------------------------- #
if __name__ == "__main__":
    # Small shapes consistent with the module's forward.
    B = 4
    input_dims = 12
    static_state_dims = 4
    n_actions = 6

    key = jax.random.PRNGKey(0)
    key, k_state, k_static = jax.random.split(key, 3)
    state = jax.random.normal(k_state, (B, input_dims), dtype=jnp.float32)
    static_state = jax.random.normal(k_static, (B, static_state_dims), dtype=jnp.float32)

    params = init_params(key, input_dims, static_state_dims, n_actions)
    fparams = prepare_fused_params(params, input_dims, static_state_dims)

    q = dueling_q_forward(state, static_state, fparams)
    q = jax.block_until_ready(q)
    assert q.shape == (B, n_actions)

    # exact-math check: kernel vs pure-JAX mirror with identical bf16-input / f32-accum math
    q_fused_ref = reference_forward_fused(state, static_state, fparams)
    assert jnp.allclose(q, q_fused_ref, atol=1e-3, rtol=1e-3), "mismatch vs fused bf16 reference"

    # semantic check vs the original full-f32 module math (loose tol for bf16 MXU inputs)
    q_f32_ref = reference_forward_f32(state, static_state, params)
    assert jnp.allclose(q, q_f32_ref, atol=5e-2, rtol=5e-2), "mismatch vs f32 reference"

    print("KERNEL_OK")
</pallas_src>

<mosaic_0001>
module attributes {stable_mosaic.version = 11 : i64} {
  func.func @kernel(%arg0: i32, %arg1: memref<16x16xbf16, #tpu.memory_space<vmem>>, %arg2: memref<144x64xbf16, #tpu.memory_space<vmem>>, %arg3: memref<8x128xf32, #tpu.memory_space<vmem>>, %arg4: memref<16x6xf32, #tpu.memory_space<vmem>>) attributes {dimension_semantics = [#tpu.dimension_semantics<parallel>], iteration_bounds = array<i64: 1>, scalar_prefetch = 0 : i64, scratch_operands = 0 : i64, tpu.core_type = #tpu.core_type<tc>, window_params = [{transform_indices = @transform_0, window_bounds = array<i64: 16, 16>}, {pipeline_mode = #tpu.pipeline_mode<synchronous>, transform_indices = @transform_1, window_bounds = array<i64: 144, 64>}, {pipeline_mode = #tpu.pipeline_mode<synchronous>, transform_indices = @transform_2, window_bounds = array<i64: 8, 128>}, {transform_indices = @transform_3, window_bounds = array<i64: 16, 6>}]} {
    %c0 = arith.constant 0 : index
    %c0_0 = arith.constant 0 : index
    %0 = vector.load %arg1[%c0, %c0_0] : memref<16x16xbf16, #tpu.memory_space<vmem>>, vector<16x16xbf16>
    %c0_1 = arith.constant 0 : index
    %c0_2 = arith.constant 0 : index
    %1 = vector.load %arg2[%c0_1, %c0_2] : memref<144x64xbf16, #tpu.memory_space<vmem>>, vector<16x32xbf16>
    %cst = arith.constant dense<0.000000e+00> : vector<16x32xf32>
    %2 = tpu.matmul %0, %1, %cst {dimension_numbers = #tpu.dot_dimension_numbers<[1], [0], [0], [1], [0, 0, 1, 1], [], []>} : vector<16x16xbf16>, vector<16x32xbf16>, vector<16x32xf32> -> vector<16x32xf32>
    %c0_3 = arith.constant 0 : index
    %c0_4 = arith.constant 0 : index
    %3 = vector.load %arg3[%c0_3, %c0_4] : memref<8x128xf32, #tpu.memory_space<vmem>>, vector<1x32xf32>
    %4 = vector.broadcast %3 : vector<1x32xf32> to vector<16x32xf32>
    %5 = arith.addf %2, %4 : vector<16x32xf32>
    %cst_5 = arith.constant 0.000000e+00 : f32
    %6 = vector.broadcast %cst_5 : f32 to vector<16x32xf32>
    %7 = arith.maximumf %5, %6 : vector<16x32xf32>
    %8 = arith.truncf %7 : vector<16x32xf32> to vector<16x32xbf16>
    %c16 = arith.constant 16 : index
    %c0_6 = arith.constant 0 : index
    %9 = vector.load %arg2[%c16, %c0_6] : memref<144x64xbf16, #tpu.memory_space<vmem>>, vector<32x32xbf16>
    %cst_7 = arith.constant dense<0.000000e+00> : vector<16x32xf32>
    %10 = tpu.matmul %8, %9, %cst_7 {dimension_numbers = #tpu.dot_dimension_numbers<[1], [0], [0], [1], [0, 0, 1, 1], [], []>} : vector<16x32xbf16>, vector<32x32xbf16>, vector<16x32xf32> -> vector<16x32xf32>
    %c1 = arith.constant 1 : index
    %c0_8 = arith.constant 0 : index
    %11 = vector.load %arg3[%c1, %c0_8] : memref<8x128xf32, #tpu.memory_space<vmem>>, vector<1x32xf32>
    %12 = vector.broadcast %11 : vector<1x32xf32> to vector<16x32xf32>
    %13 = arith.addf %10, %12 : vector<16x32xf32>
    %cst_9 = arith.constant 0.000000e+00 : f32
    %14 = vector.broadcast %cst_9 : f32 to vector<16x32xf32>
    %15 = arith.maximumf %13, %14 : vector<16x32xf32>
    %16 = arith.truncf %15 : vector<16x32xf32> to vector<16x32xbf16>
    %c48 = arith.constant 48 : index
    %c0_10 = arith.constant 0 : index
    %17 = vector.load %arg2[%c48, %c0_10] : memref<144x64xbf16, #tpu.memory_space<vmem>>, vector<32x64xbf16>
    %cst_11 = arith.constant dense<0.000000e+00> : vector<16x64xf32>
    %18 = tpu.matmul %16, %17, %cst_11 {dimension_numbers = #tpu.dot_dimension_numbers<[1], [0], [0], [1], [0, 0, 1, 1], [], []>} : vector<16x32xbf16>, vector<32x64xbf16>, vector<16x64xf32> -> vector<16x64xf32>
    %c2 = arith.constant 2 : index
    %c0_12 = arith.constant 0 : index
    %19 = vector.load %arg3[%c2, %c0_12] : memref<8x128xf32, #tpu.memory_space<vmem>>, vector<1x64xf32>
    %20 = vector.broadcast %19 : vector<1x64xf32> to vector<16x64xf32>
    %21 = arith.addf %18, %20 : vector<16x64xf32>
    %cst_13 = arith.constant 0.000000e+00 : f32
    %22 = vector.broadcast %cst_13 : f32 to vector<16x64xf32>
    %23 = arith.maximumf %21, %22 : vector<16x64xf32>
    %24 = arith.truncf %23 : vector<16x64xf32> to vector<16x64xbf16>
    %c80 = arith.constant 80 : index
    %c0_14 = arith.constant 0 : index
    %25 = vector.load %arg2[%c80, %c0_14] : memref<144x64xbf16, #tpu.memory_space<vmem>>, vector<64x6xbf16>
    %cst_15 = arith.constant dense<0.000000e+00> : vector<16x6xf32>
    %26 = tpu.matmul %24, %25, %cst_15 {dimension_numbers = #tpu.dot_dimension_numbers<[1], [0], [0], [1], [0, 0, 1, 1], [], []>} : vector<16x64xbf16>, vector<64x6xbf16>, vector<16x6xf32> -> vector<16x6xf32>
    %c3 = arith.constant 3 : index
    %c0_16 = arith.constant 0 : index
    %27 = vector.load %arg3[%c3, %c0_16] : memref<8x128xf32, #tpu.memory_space<vmem>>, vector<1x6xf32>
    %28 = vector.broadcast %27 : vector<1x6xf32> to vector<16x6xf32>
    %29 = arith.addf %26, %28 : vector<16x6xf32>
    %c0_17 = arith.constant 0 : index
    %c0_18 = arith.constant 0 : index
    %30 = vector.load %arg4[%c0_17, %c0_18] : memref<16x6xf32, #tpu.memory_space<vmem>>, vector<16x6xf32>
    tpu.vector_store %arg4[%c0_17, %c0_18], %29 {strides = array<i32>} : memref<16x6xf32, #tpu.memory_space<vmem>>, vector<16x6xf32>,
    return
  }
  func.func @transform_0(%arg0: i32) -> (i32, i32) {
    %c0_i32 = arith.constant 0 : i32
    %c0_i32_0 = arith.constant 0 : i32
    return %arg0, %c0_i32 : i32, i32
  }
  func.func @transform_1(%arg0: i32) -> (i32, i32) {
    %c0_i32 = arith.constant 0 : i32
    %c0_i32_0 = arith.constant 0 : i32
    %c0_i32_1 = arith.constant 0 : i32
    return %c0_i32, %c0_i32_0 : i32, i32
  }
  func.func @transform_2(%arg0: i32) -> (i32, i32) {
    %c0_i32 = arith.constant 0 : i32
    %c0_i32_0 = arith.constant 0 : i32
    %c0_i32_1 = arith.constant 0 : i32
    return %c0_i32, %c0_i32_0 : i32, i32
  }
  func.func @transform_3(%arg0: i32) -> (i32, i32) {
    %c0_i32 = arith.constant 0 : i32
    %c0_i32_0 = arith.constant 0 : i32
    return %arg0, %c0_i32 : i32, i32
  }
}

</mosaic_0001>

<bundles_post_ra>
// kernel: tpu_custom_call.1
= control target key start
LH: loop header
LB: loop body
LE: loop exit
PB: predicated region body
PF: predicated region fallthrough
CT: control target
= control target key end

     0   :  { %vm32_vm0 = vcmask 130048   ;;  %vm71_vm1 = vcmask 261120   ;;  %vm164_vm2 = vcmask 523264   ;;  %vm182_vm3 = vcmask 48128   ;;  %s315_s1 = inlined_call_operand.vmem [shape: bf16[144,64], index: 1, kind: input, shape index: {}]   ;;  %s316_s0 = inlined_call_operand.vmem [shape: bf16[16,16], index: 0, kind: input, shape index: {}]   ;;  %s317_s2 = inlined_call_operand.vmem [shape: f32[8,128], index: 2, kind: input, shape index: {}]   ;;  %s318_s3 = inlined_call_operand.vmem [shape: f32[16,6], index: 3, kind: output, shape index: {}]  }
   0x1   :  { %v234_v0 = vld [vmem:[%s315_s1] sm:$0xff]  ;;  %v236_v2 = vld [vmem:[%s315_s1 + $0x10] sm:$0xff]  ;;  %v235_v3 = vld [vmem:[%s315_s1 + $0x8] sm:$0xff] }
   0x2   :  { %v233_v1 = vld [vmem:[%s316_s0] sm:$0xff]  ;;  %43 = vmatpush.bf16.msra.mxu0 %v234_v0  ;;  %81 = vmatpush.bf16.msra.mxu1 %v236_v2  ;;  %v237_v13 = vld [vmem:[%s315_s1 + $0x18] sm:$0xff]  ;;  %v240_v24 = vld [vmem:[%s315_s1 + $0x30] sm:$0xff] }
   0x3   :  { %v243_v5 = vld [vmem:[%s317_s2] ss:$0 sm:$0xff]  ;;  %v244_v15 = vld [vmem:[%s317_s2 + $0x1] ss:$0 sm:$0xff]  ;;  %v241_v23 = vld [vmem:[%s315_s1 + $0x38] sm:$0xff] }
   0x4   :  { %v238_v12 = vld [vmem:[%s315_s1 + $0x20] sm:$0xff]  ;;  %v239_v25 = vld [vmem:[%s315_s1 + $0x28] sm:$0xff] }
   0x5   :  { %197 = vmatmul.msk.bf16.vlgmr.msra.gmra.mxu0 %vm32_vm0, %v233_v1  ;;  %119 = vmatpush.bf16.msra.mxu2 %v238_v12  ;;  %v242_v22 = vld [vmem:[%s315_s1 + $0x40] sm:$0xff] }
   0x6   :  { %82 = vmatpush.bf16.msra.mxu1 %v235_v3  ;;  %172 = vmatpush.bf16.msra.mxu3 %v242_v22  ;;  %v245_v27 = vld [vmem:[%s317_s2 + $0x2] ss:$0 sm:$0xff]  ;;  %v246_v34 = vld [vmem:[%s317_s2 + $0x3] ss:$0 sm:$0xff] }
   0x9   :  { %120 = vmatpush.bf16.msra.mxu2 %v237_v13 }
   0xa   :  { %173 = vmatpush.bf16.msra.mxu3 %v241_v23 }
   0xe   :  { %174 = vmatpush.bf16.msra.mxu3 %v240_v24 }
  0x12   :  { %175 = vmatpush.bf16.msra.mxu3 %v239_v25 }
  0x82   :  { %v45_v4 = vpop.f32.mrf.mxu0 }
  0x83   :  { %v46_v6 = vadd.f32 %v243_v5, %v45_v4 }
  0x85   :  { %v50_v9 = vmax.f32 %v46_v6, 0.0 }
  0x8a   :  { %v47_v7 = vpop.f32.mrf.mxu0 }
  0x8b   :  { %v48_v8 = vadd.f32 %v243_v5, %v47_v7 }
  0x8d   :  { %v51_v10 = vmax.f32 %v48_v8, 0.0 }
  0x8f   :  { %v52_v11 = vpack.c.bf16 %v51_v10, %v50_v9 }
  0x91   :  { %206 = vmatmul.msk.bf16.vlgmr.msra.gmra.mxu1 %vm71_vm1, %v52_v11 }
 0x10e   :  { %v84_v14 = vpop.f32.mrf.mxu1 }
 0x10f   :  { %v85_v16 = vadd.f32 %v244_v15, %v84_v14 }
 0x111   :  { %v89_v19 = vmax.f32 %v85_v16, 0.0 }
 0x116   :  { %v86_v17 = vpop.f32.mrf.mxu1 }
 0x117   :  { %v87_v18 = vadd.f32 %v244_v15, %v86_v17 }
 0x119   :  { %v90_v20 = vmax.f32 %v87_v18, 0.0 }
 0x11b   :  { %v91_v21 = vpack.c.bf16 %v90_v20, %v89_v19 }
 0x11d   :  { %215 = vmatmul.msk.bf16.vlgmr.msra.gmra.mxu2 %vm71_vm1, %v91_v21 }
 0x1a0   :  { %v122_v26 = vpop.f32.mrf.mxu2 }
 0x1a1   :  { %v123_v28 = vadd.f32 %v245_v27, %v122_v26 }
 0x1a3   :  { %v127_v31 = vmax.f32 %v123_v28, 0.0 }
 0x1a8   :  { %v124_v29 = vpop.f32.mrf.mxu2 }
 0x1a9   :  { %v125_v30 = vadd.f32 %v245_v27, %v124_v29 }
 0x1ab   :  { %v128_v32 = vmax.f32 %v125_v30, 0.0 }
 0x1ad   :  { %v129_v33 = vpack.c.bf16 %v128_v32, %v127_v31 }
 0x1af   :  { %232 = vmatmul.msk.bf16.vlgmr.msra.gmra.mxu3 %vm164_vm2, %v129_v33 }
 0x232   :  { %v177_v35 = vpop.f32.mrf.mxu3 }
 0x233   :  { %v178_v36 = vadd.f32 %v246_v34, %v177_v35 }
 0x235   :  { %183 = vst.msk [vmem:[%s318_s3] sm:$0xff] %vm182_vm3, %v178_v36 }
 0x23a   :  { %v179_v37 = vpop.f32.mrf.mxu3 }
 0x23b   :  { %v180_v38 = vadd.f32 %v246_v34, %v179_v37 }
 0x23d   :  { %184 = vst.msk [vmem:[%s318_s3 + $0x8] sm:$0xff] %vm182_vm3, %v180_v38 }

</bundles_post_ra>
